<compile_context>
chip_gen: v6e
topology: v6e:2x2x1
jax: 0.10.0
libtpu: 0.0.40
codegen_flags: <defaults>
</compile_context>

<pallas_src>
import functools

import jax
import jax.numpy as jnp
from jax.experimental import pallas as pl
from jax.experimental.pallas import tpu as pltpu


# Per-grid-step working-set budget and scoped-VMEM limit.  Conservative enough
# for v7x (64 MiB physical); well under v5e/v6e's 128 MiB.
_VMEM_STEP_BUDGET_BYTES = 32 * 1024 * 1024
_VMEM_LIMIT_BYTES = 48 * 1024 * 1024


# ----------------------------------------------------------------------------
# Kernel
# ----------------------------------------------------------------------------

def _chan_norm_kernel(x_ref, g_ref, b_ref, o_ref, *, eps, inv_c):
    # x: (Nb, C, T)   g, b: (C, 1)   o: (Nb, C, T)
    x = x_ref[...].astype(jnp.float32)
    # Channel statistics (sublane reduction -> XLU), computed in f32.
    mean = jnp.sum(x, axis=1, keepdims=True) * inv_c            # (Nb, 1, T)
    centered = x - mean
    var = jnp.sum(centered * centered, axis=1, keepdims=True) * inv_c
    # Hoisted: ONE reciprocal per column instead of a per-element divide over
    # the whole (C, T) tile.  Kept exact (not approx=True) to stay within
    # 1e-5 of the reference while preserving the module's eps-on-std form.
    inv_std = 1.0 / (jnp.sqrt(var) + eps)                       # (Nb, 1, T)
    y = centered * inv_std
    o_ref[...] = (y * g_ref[...] + b_ref[...]).astype(o_ref.dtype)


# ----------------------------------------------------------------------------
# Tile / batch-block selection
# ----------------------------------------------------------------------------

def _pick_tile_and_nb(B, C, HW_pad, itemsize, budget_bytes):
    """Pick (lane tile, batch-block) under a per-step VMEM working-set budget.

    Per element of a block we hold: 2 double-buffered input copies, 2 output
    copies (itemsize each) and ~2 f32 in-kernel temporaries (x_f32, centered).
    """
    bytes_per_elem = 4 * itemsize + 8
    budget_elems = max(budget_bytes // bytes_per_elem, 128)

    # Largest lane-dense (multiple-of-128) tile dividing HW_pad that fits.
    max_tile = max(budget_elems // C, 128)
    tile = 128
    t = 128
    while t <= HW_pad:
        if HW_pad % t == 0 and t <= max_tile:
            tile = t
        t += 128

    # If a whole sample fits, fold several batch samples per step, but keep at
    # least 2 grid steps so a v7x megacore can split the work across its TCs.
    nb = 1
    if tile == HW_pad and B > 1:
        for d in range(2, B + 1):
            if B % d == 0 and B // d >= 2 and d * C * HW_pad <= budget_elems:
                nb = d
    return tile, nb


# ----------------------------------------------------------------------------
# Wrapper
# ----------------------------------------------------------------------------

def chan_norm(x, g, b, eps=1e-5, *,
              vmem_step_budget_bytes=_VMEM_STEP_BUDGET_BYTES):
    """ChanNorm forward.  x: (B, C, H, W) NCHW; g, b: (1, C, 1, 1)."""
    B, C, H, W = x.shape
    HW = H * W
    HW_pad = ((HW + 127) // 128) * 128
    itemsize = jnp.dtype(x.dtype).itemsize

    xf = x.reshape(B, C, HW)
    if HW_pad != HW:
        # Zero-pad the lane axis to a multiple of 128 so output stores stay
        # lane-dense (padded columns are sliced off afterwards).
        xf = jnp.pad(xf, ((0, 0), (0, 0), (0, HW_pad - HW)))

    # Keep affine params in f32 (tiny (C,1) blocks; avoids quantizing them for
    # narrow input dtypes before the f32 math in the kernel).
    gf = g.reshape(C, 1).astype(jnp.float32)
    bf = b.reshape(C, 1).astype(jnp.float32)

    tile, nb = _pick_tile_and_nb(B, C, HW_pad, itemsize, vmem_step_budget_bytes)

    kern = functools.partial(_chan_norm_kernel, eps=eps, inv_c=1.0 / C)

    # Advisory cost: one read + one write of x, ~7 VPU ops/elem, one sqrt and
    # one reciprocal per (b, h, w) column.
    cost = pl.CostEstimate(
        flops=7 * B * C * HW_pad,
        transcendentals=2 * B * HW_pad,
        bytes_accessed=2 * B * C * HW_pad * itemsize,
    )

    out = pl.pallas_call(
        kern,
        grid=(B // nb, HW_pad // tile),
        in_specs=[
            pl.BlockSpec((nb, C, tile), lambda i, j: (i, 0, j)),
            pl.BlockSpec((C, 1), lambda i, j: (0, 0)),
            pl.BlockSpec((C, 1), lambda i, j: (0, 0)),
        ],
        out_specs=pl.BlockSpec((nb, C, tile), lambda i, j: (i, 0, j)),
        out_shape=jax.ShapeDtypeStruct((B, C, HW_pad), x.dtype),
        compiler_params=pltpu.CompilerParams(
            dimension_semantics=("parallel", "parallel"),
            vmem_limit_bytes=_VMEM_LIMIT_BYTES,
        ),
        cost_estimate=cost,
    )(xf, gf, bf)

    if HW_pad != HW:
        out = out[:, :, :HW]
    return out.reshape(B, C, H, W)


# ----------------------------------------------------------------------------
# Pure-JAX reference (mirrors the PyTorch module exactly)
# ----------------------------------------------------------------------------

def chan_norm_ref(x, g, b, eps=1e-5):
    mean = jnp.mean(x, axis=1, keepdims=True)
    var = jnp.mean((x - mean) ** 2, axis=1, keepdims=True)   # unbiased=False
    return (x - mean) / (jnp.sqrt(var) + eps) * g + b


# ----------------------------------------------------------------------------

if __name__ == "__main__":
    key = jax.random.PRNGKey(0)
    k1, k2, k3, k4, k5, k6 = jax.random.split(key, 6)

    def check(x, g, b, **kw):
        out = jax.block_until_ready(chan_norm(x, g, b, **kw))
        ref = chan_norm_ref(x, g, b)
        assert out.shape == x.shape and out.dtype == x.dtype
        assert bool(jnp.all(jnp.isfinite(out)))
        assert bool(jnp.allclose(out, ref, atol=1e-5, rtol=1e-5))

    # 1) Small NCHW case consistent with the module.
    B, C, H, W = 2, 4, 16, 16
    x = jax.random.normal(k1, (B, C, H, W), jnp.float32)
    g = 1.0 + 0.1 * jax.random.normal(k2, (1, C, 1, 1), jnp.float32)
    b = 0.1 * jax.random.normal(k3, (1, C, 1, 1), jnp.float32)
    check(x, g, b)

    # 2) Larger slab: whole H*W handled as one lane-dense block.
    x2 = jax.random.normal(k4, (2, 32, 64, 64), jnp.float32)
    check(x2, jnp.ones((1, 32, 1, 1), jnp.float32),
          jnp.zeros((1, 32, 1, 1), jnp.float32))

    # 3) Small per-sample slab -> several batch samples folded per step (nb>1).
    x3 = jax.random.normal(k5, (8, 4, 16, 16), jnp.float32)
    check(x3,
          1.0 + 0.1 * jax.random.normal(k2, (1, 4, 1, 1), jnp.float32),
          0.1 * jax.random.normal(k3, (1, 4, 1, 1), jnp.float32))

    # 4) H*W not a multiple of 128 -> padded lane axis, lane-dense stores kept.
    x4 = jax.random.normal(k6, (2, 4, 12, 12), jnp.float32)
    check(x4, jnp.ones((1, 4, 1, 1), jnp.float32),
          jnp.zeros((1, 4, 1, 1), jnp.float32))

    # 5) Multi-tile H*W path (forced with an artificially tiny VMEM budget).
    x5 = jax.random.normal(k1, (2, 4, 32, 32), jnp.float32)
    check(x5, jnp.ones((1, 4, 1, 1), jnp.float32),
          jnp.zeros((1, 4, 1, 1), jnp.float32),
          vmem_step_budget_bytes=64 * 1024)

    print("KERNEL_OK")
</pallas_src>

<mosaic_0001>
module attributes {stable_mosaic.version = 11 : i64} {
  func.func @_chan_norm_kernel(%arg0: i32, %arg1: i32, %arg2: memref<1x4x256xf32, #tpu.memory_space<vmem>>, %arg3: memref<4x1xf32, #tpu.memory_space<vmem>>, %arg4: memref<4x1xf32, #tpu.memory_space<vmem>>, %arg5: memref<1x4x256xf32, #tpu.memory_space<vmem>>) attributes {dimension_semantics = [#tpu.dimension_semantics<parallel>, #tpu.dimension_semantics<parallel>], iteration_bounds = array<i64: 2, 1>, scalar_prefetch = 0 : i64, scratch_operands = 0 : i64, tpu.core_type = #tpu.core_type<tc>, window_params = [{transform_indices = @transform_0, window_bounds = array<i64: 1, 4, 256>}, {pipeline_mode = #tpu.pipeline_mode<synchronous>, transform_indices = @transform_1, window_bounds = array<i64: 4, 1>}, {pipeline_mode = #tpu.pipeline_mode<synchronous>, transform_indices = @transform_2, window_bounds = array<i64: 4, 1>}, {transform_indices = @transform_3, window_bounds = array<i64: 1, 4, 256>}]} {
    %c0 = arith.constant 0 : index
    %c0_0 = arith.constant 0 : index
    %c0_1 = arith.constant 0 : index
    %0 = vector.load %arg2[%c0, %c0_0, %c0_1] : memref<1x4x256xf32, #tpu.memory_space<vmem>>, vector<1x4x256xf32>
    %cst = arith.constant dense<0.000000e+00> : vector<1x256xf32>
    %1 = vector.multi_reduction <add>, %0, %cst [1] : vector<1x4x256xf32> to vector<1x256xf32>
    %2 = vector.shape_cast %1 : vector<1x256xf32> to vector<1x1x256xf32>
    %cst_2 = arith.constant 2.500000e-01 : f32
    %3 = vector.broadcast %cst_2 : f32 to vector<1x1x256xf32>
    %4 = arith.mulf %2, %3 : vector<1x1x256xf32>
    %5 = vector.broadcast %4 : vector<1x1x256xf32> to vector<1x4x256xf32>
    %6 = arith.subf %0, %5 : vector<1x4x256xf32>
    %7 = arith.mulf %6, %6 : vector<1x4x256xf32>
    %cst_3 = arith.constant dense<0.000000e+00> : vector<1x256xf32>
    %8 = vector.multi_reduction <add>, %7, %cst_3 [1] : vector<1x4x256xf32> to vector<1x256xf32>
    %9 = vector.shape_cast %8 : vector<1x256xf32> to vector<1x1x256xf32>
    %cst_4 = arith.constant 2.500000e-01 : f32
    %10 = vector.broadcast %cst_4 : f32 to vector<1x1x256xf32>
    %11 = arith.mulf %9, %10 : vector<1x1x256xf32>
    %12 = math.sqrt %11 : vector<1x1x256xf32>
    %cst_5 = arith.constant 9.99999974E-6 : f32
    %13 = vector.broadcast %cst_5 : f32 to vector<1x1x256xf32>
    %14 = arith.addf %12, %13 : vector<1x1x256xf32>
    %cst_6 = arith.constant 1.000000e+00 : f32
    %15 = vector.broadcast %cst_6 : f32 to vector<1x1x256xf32>
    %16 = arith.divf %15, %14 : vector<1x1x256xf32>
    %17 = vector.broadcast %16 : vector<1x1x256xf32> to vector<1x4x256xf32>
    %18 = arith.mulf %6, %17 : vector<1x4x256xf32>
    %c0_7 = arith.constant 0 : index
    %c0_8 = arith.constant 0 : index
    %19 = vector.load %arg3[%c0_7, %c0_8] : memref<4x1xf32, #tpu.memory_space<vmem>>, vector<4x1xf32>
    %20 = vector.shape_cast %19 : vector<4x1xf32> to vector<1x4x1xf32>
    %21 = vector.broadcast %20 : vector<1x4x1xf32> to vector<1x4x256xf32>
    %22 = arith.mulf %18, %21 : vector<1x4x256xf32>
    %c0_9 = arith.constant 0 : index
    %c0_10 = arith.constant 0 : index
    %23 = vector.load %arg4[%c0_9, %c0_10] : memref<4x1xf32, #tpu.memory_space<vmem>>, vector<4x1xf32>
    %24 = vector.shape_cast %23 : vector<4x1xf32> to vector<1x4x1xf32>
    %25 = vector.broadcast %24 : vector<1x4x1xf32> to vector<1x4x256xf32>
    %26 = arith.addf %22, %25 : vector<1x4x256xf32>
    %c0_11 = arith.constant 0 : index
    %c0_12 = arith.constant 0 : index
    %c0_13 = arith.constant 0 : index
    %27 = vector.load %arg5[%c0_11, %c0_12, %c0_13] : memref<1x4x256xf32, #tpu.memory_space<vmem>>, vector<1x4x256xf32>
    tpu.vector_store %arg5[%c0_11, %c0_12, %c0_13], %26 {strides = array<i32>} : memref<1x4x256xf32, #tpu.memory_space<vmem>>, vector<1x4x256xf32>,
    return
  }
  func.func @transform_0(%arg0: i32, %arg1: i32) -> (i32, i32, i32) {
    %c0_i32 = arith.constant 0 : i32
    %c0_i32_0 = arith.constant 0 : i32
    return %arg0, %c0_i32, %arg1 : i32, i32, i32
  }
  func.func @transform_1(%arg0: i32, %arg1: i32) -> (i32, i32) {
    %c0_i32 = arith.constant 0 : i32
    %c0_i32_0 = arith.constant 0 : i32
    %c0_i32_1 = arith.constant 0 : i32
    return %c0_i32, %c0_i32_0 : i32, i32
  }
  func.func @transform_2(%arg0: i32, %arg1: i32) -> (i32, i32) {
    %c0_i32 = arith.constant 0 : i32
    %c0_i32_0 = arith.constant 0 : i32
    %c0_i32_1 = arith.constant 0 : i32
    return %c0_i32, %c0_i32_0 : i32, i32
  }
  func.func @transform_3(%arg0: i32, %arg1: i32) -> (i32, i32, i32) {
    %c0_i32 = arith.constant 0 : i32
    %c0_i32_0 = arith.constant 0 : i32
    return %arg0, %c0_i32, %arg1 : i32, i32, i32
  }
}

</mosaic_0001>

<bundles_post_ra>
// kernel: tpu_custom_call.1
= control target key start
LH: loop header
LB: loop body
LE: loop exit
PB: predicated region body
PF: predicated region fallthrough
CT: control target
= control target key end

     0   :  { %8 = vsyncpa [#allocation3], 0  ;;  %s781_s0 = inlined_call_operand.hbm [shape: f32[2,4,256], index: 0, kind: input, shape index: {}]   ;;  %s782_s1 = inlined_call_operand.vmem [shape: f32[4,1], index: 1, kind: input, shape index: {}]   ;;  %s783_s2 = inlined_call_operand.vmem [shape: f32[4,1], index: 2, kind: input, shape index: {}]   ;;  %s784_s3 = inlined_call_operand.hbm [shape: f32[2,4,256], index: 3, kind: output, shape index: {}]  }
   0x1   :  { %10 = vsyncpa [#allocation3 + $0x1], 0 }
   0x2   :  { %11 = vsyncpa [#allocation4], 0 }
   0x3   :  { %13 = vsyncpa [#allocation4 + $0x1], 0  ;;  %s633_s12 = smov 0   ;;  %s635_s13 = smov 0  }
   0x4   :  { %s637_s14 = smov 0   ;;  %s639_s15 = smov 0  }
   0x5   :  { %s641_s16 = smov 0   ;;  %s643_s17 = smov 0  }
   0x6 LB: > { %s408_s18 = sadd.s32 4294967295, %s607_s17   ;;  %s409_s19 = sadd.s32 4294967294, %s607_s17   ;;  %s607_s17 = sphi %s643_s17, %s19_s17   ;;  %s603_s16 = sphi %s641_s16, %s796_s16   ;;  %s599_s15 = sphi %s639_s15, %s795_s15   ;;  %s595_s14 = sphi %s637_s14, %s794_s14   ;;  %s591_s13 = sphi %s635_s13, %s793_s13   ;;  %s587_s12 = sphi %s633_s12, %s792_s12  }
   0x7   : > { %s31_s20 = sadd.s32 1, %s603_s16  ;;  %s40_s21 = sadd.s32 1, %s595_s14 }
   0x8   : > { %p33_p0 = scmp.ge.s32.totalorder %s31_s20, 2  ;;  %p47_p1 = scmp.ne.s32.totalorder %s595_s14, %s591_s13 }
   0x9   : > { %p48_p2 = scmp.eq.s32.totalorder %s607_s17, 0  ;;  %p53_p3 = scmp.ne.s32.totalorder %s591_s13, %s587_s12 }
   0xa   : > { %s798_s20 = smov (%p33_p0, %s31_s20), 0  ;;  %p54_p5 = scmp.eq.s32.totalorder %s408_s18, 0 }
   0xb   : > { %p674_p4 = por %p48_p2, %p47_p1  ;;  %s35_s23 = ssub.s32 %s603_s16, %s798_s20 }
   0xc   : > { %p121_p6 = scmp.eq.s32.totalorder %s408_s18, 1  ;;  %p38_p7 = scmp.eq.s32.totalorder %s35_s23, 0 }
   0xd   : > { %p680_p8 = por %p54_p5, %p53_p3  ;;  %p127_p10 = scmp.eq.s32.totalorder %s409_s19, 1 }
   0xe   : > { %p684_p9 = por %p121_p6, %p47_p1  ;;  %p437_p13 = scmp.lt.s32.totalorder %s607_s17, 2 }
   0xf   : > { %s689_s26 = scalar_select %p38_p7, %s595_s14, %s40_s21  }
  0x10   : > { %p691_p11 = por %p127_p10, %p53_p3  ;;  %s153_s28 = sand.u32 1, %s595_s14  }
  0x11   : > { %s412_s29 = sshll.u32 %s153_s28, 3  ;;  %s423_s30 = sshll.u32 %s603_s16, 7 }
  0x12   : > { %s788_s27 = scalar_select %p691_p11, 1, 0 }
  0x13   : > { %s165_s6 = scalar_lea.hbm %s781_s0, %s423_s30  ;;  %s157_s7 = scalar_lea.vmem [#allocation2], %s412_s29 }
  0x14   : > { %s167_s8 = sshll.u32 %s157_s7, 4  ;;  %p704_p0 = pnand %p437_p13, %p674_p4  ;;  %s168_s8 = int_to_ptr.vmem [resolvable:$true] %s167_s8 }
  0x15   : > { %p415_p1 = scmp.ge.s32.totalorder %s607_s17, 1  ;;  %p172_p2 = scmp.lt.s32.totalorder %s607_s17, 3 }
  0x16   : > { %s154_s10 = scalar_lea.sflag [#allocation3], %s153_s28  ;;  %p501_p3 = pneg %p704_p0 }
  0x17   : > { %s512_s11 = scalar_lea.vmem %s168_s8, 128  ;;  %s609_s18 = smov [#allocation2]  }
  0x18   : > { %p513_p5 = scmp.ne.s32.totalorder %s168_s8, %s512_s11  ;;  %s517_s19 = sshll.u32 %s609_s18, 4  ;;  %s518_s19 = int_to_ptr.vmem [resolvable:$false] %s517_s19 }
  0x19   : > { %s519_s21 = scalar_lea.vmem %s518_s19, 256  ;;  %p520_p10 = scmp.lt.s32.totalorder %s168_s8, %s518_s19 }
  0x1a   : > { %p515_p6 = pnand %p513_p5, %p501_p3  ;;  %p521_p12 = scmp.lt.s32.totalorder %s519_s21, %s512_s11 }
  0x1c   : > { %p516_p7 = pneg %p515_p6  ;;  %p522_p4 = por %p521_p12, %p520_p10 }
  0x1e   : > { %p523_p13 = pnand %p522_p4, %p516_p7 }
  0x20   : > { %526 = shalt.err (!%p523_p13)
}
  0x21   : > { %432 = dma.hbm_to_vmem [thread:$0]  (!%p704_p0), %s165_s6, 128, %s168_s8, %s154_s10  }
  0x22   : > { %p173_p11 = pnand %p415_p1, %p172_p2 }
  0x23   : > { %s719_s22 = sand.u32 (!%p173_p11), 1, %s591_s13  }
  0x24   : > { %176 = sbr.rel (%p173_p11) target bundleno = 189 (0xbd), region = 32  ;;  %s416_s23 = sshll.u32 (!%p173_p11), %s719_s22, 3 }
  0x25   : > { %s179_s28 = scalar_lea.sflag (!%p173_p11), [#allocation3], %s719_s22  ;;  %s182_s29 = scalar_lea.vmem (!%p173_p11), [#allocation2], %s416_s23 }
  0x29   : > { %578 = dma.done.wait (%p680_p8), %s179_s28, 128  }
  0x2a   : > { %580 = vsyncadd (%p680_p8), %s179_s28, 4294967168  ;;  %v610_v0 = vmov 0   ;;  %vm211_vm0 = vcmask 1043456   ;;  %v278_v1 = vld [vmem:[%s782_s1] sm:$0xf]  ;;  %v286_v55 = vlaneseq  ;;  %s424_s24 = sshll.u32 %s599_s15, 7 }
  0x2b   : > { %489 = vset.pattern.permute.xlu0 %v610_v0  ;;  %v207_v2 = vld [vmem:[%s182_s29] sm:$0xff]  ;;  %v611_v53 = vmov 839922192   ;;  %s204_s7 = scalar_lea.vmem [#allocation5], %s416_s23  ;;  %s322_s11 = scalar_lea.hbm %s784_s3, %s424_s24 }
  0x2c   : > { %281 = vperm.xlu0 %489, %v278_v1   ;;  %v209_v3 = vcombine.high %v207_v2, %v207_v2  ;;  %v212_v4 = vsel %vm211_vm0, %v207_v2, 0.0  ;;  %v292_v5 = vld [vmem:[%s783_s2] sm:$0xf]  ;;  %v284_v54 = vunpack.c.l.s4 %v611_v53  ;;  %v287_v58 = vshrl.u32 %v286_v55, 7  ;;  %s324_s8 = sshll.u32 %s204_s7, 4  ;;  %s308_s18 = scalar_lea.sflag [#allocation4], %s719_s22  ;;  %s325_s8 = int_to_ptr.vmem [resolvable:$true] %s324_s8 }
  0x2d   : > { %v213_v6 = vrot.slane %v212_v4, 4  ;;  %s527_s19 = scalar_lea.vmem %s325_s8, 128  ;;  %s612_s21 = smov [#allocation5]  }
  0x2e   : > { %v219_v7 = vsel %vm211_vm0, %v209_v3, 0.0  ;;  %v285_v57 = vunpack.c.0.s8 %v284_v54  ;;  %p528_p8 = scmp.ne.s32.totalorder %s325_s8, %s527_s19  ;;  %s531_s15 = sshll.u32 %s612_s21, 4  ;;  %s532_s15 = int_to_ptr.vmem [resolvable:$false] %s531_s15 }
  0x2f   : > { %v214_v8 = vadd.f32 %v213_v6, %v212_v4  ;;  %v220_v9 = vrot.slane %v219_v7, 4  ;;  %s533_s23 = scalar_lea.vmem %s532_s15, 256  ;;  %p534_p0 = scmp.lt.s32.totalorder %s325_s8, %s532_s15 }
  0x30   : > { %295 = vperm.xlu0 %489, %v292_v5   ;;  %v288_v60 = vsub.s32 %v285_v57, %v287_v58  ;;  %p529_p11 = pnand %p528_p8, %p684_p9  ;;  %p535_p1 = scmp.lt.s32.totalorder %s533_s23, %s527_s19 }
  0x31   : > { %v221_v10 = vadd.f32 %v220_v9, %v219_v7  ;;  %v215_v11 = vrot.slane %v214_v8, 2 }
  0x32   : > { %p530_p12 = pneg %p529_p11  ;;  %p536_p2 = por %p535_p1, %p534_p0 }
  0x33   : > { %v222_v12 = vrot.slane %v221_v10, 2  ;;  %v216_v13 = vadd.f32 %v215_v11, %v214_v8 }
  0x34   : > { %p537_p3 = pnand %p536_p2, %p530_p12 }
  0x35   : > { %v223_v14 = vadd.f32 %v222_v12, %v221_v10  ;;  %v217_v15 = vrot.slane %v216_v13, 1 }
  0x37   : > { %v224_v16 = vrot.slane %v223_v14, 1  ;;  %v218_v17 = vadd.f32 %v217_v15, %v216_v13 }
  0x39   : > { %v225_v18 = vadd.f32 %v224_v16, %v223_v14  ;;  %v226_v19 = vmul.f32 0.25, %v218_v17 }
  0x3b   : > { %v227_v20 = vmul.f32 0.25, %v225_v18 }
  0x3d   : > { %v230_v21 = vcombine.low %v226_v19, %v227_v20 }
  0x3f   : > { %v232_v22 = vsub.f32 %v207_v2, %v230_v21 }
  0x41   : > { %v233_v23 = vmul.f32 %v232_v22, %v232_v22 }
  0x43   : > { %v235_v24 = vcombine.high %v233_v23, %v233_v23  ;;  %v237_v25 = vsel %vm211_vm0, %v233_v23, 0.0 }
  0x44   : > { %v238_v27 = vrot.slane %v237_v25, 4 }
  0x45   : > { %v244_v26 = vsel %vm211_vm0, %v235_v24, 0.0 }
  0x46   : > { %v245_v28 = vrot.slane %v244_v26, 4  ;;  %v239_v29 = vadd.f32 %v238_v27, %v237_v25 }
  0x48   : > { %v246_v30 = vadd.f32 %v245_v28, %v244_v26  ;;  %v240_v31 = vrot.slane %v239_v29, 2 }
  0x4a   : > { %v247_v32 = vrot.slane %v246_v30, 2  ;;  %v241_v33 = vadd.f32 %v240_v31, %v239_v29 }
  0x4c   : > { %v248_v34 = vadd.f32 %v247_v32, %v246_v30  ;;  %v242_v35 = vrot.slane %v241_v33, 1 }
  0x4e   : > { %v249_v36 = vrot.slane %v248_v34, 1  ;;  %v243_v37 = vadd.f32 %v242_v35, %v241_v33 }
  0x50   : > { %v250_v38 = vadd.f32 %v249_v36, %v248_v34  ;;  %v251_v39 = vmul.f32 0.25, %v243_v37 }
  0x52   : > { %v252_v40 = vmul.f32 0.25, %v250_v38  ;;  %491 = vrsqrt.f32 %v251_v39  ;;  %vm255_vm1 = vcmp.eq.f32.partialorder %v251_v39, inf  ;;  %v258_v45 = vand.u32 2147483648, %v251_v39 }
  0x53   : > { %vm257_vm3 = vcmp.eq.f32.partialorder %v251_v39, 0.0 }
  0x54   : > { %493 = vrsqrt.f32 %v252_v40  ;;  %vm262_vm2 = vcmp.eq.f32.partialorder %v252_v40, inf  ;;  %v265_v47 = vand.u32 2147483648, %v252_v40  ;;  %vm264_vm4 = vcmp.eq.f32.partialorder %v252_v40, 0.0 }
  0x5f   : > { %v492_v41 = vpop.eup %491 }
  0x60   : > { %v254_v43 = vmul.f32 %v492_v41, %v251_v39 }
  0x61   : > { %v494_v42 = vpop.eup %493 }
  0x62   : > { %v261_v44 = vmul.f32 %v494_v42, %v252_v40  ;;  %v256_v46 = vsel %vm255_vm1, %v251_v39, %v254_v43 }
  0x63   : > { %v259_v49 = vsel %vm257_vm3, %v258_v45, %v256_v46 }
  0x64   : > { %v263_v48 = vsel %vm262_vm2, %v252_v40, %v261_v44  ;;  %v267_v51 = vadd.f32 1e-05, %v259_v49 }
  0x65   : > { %v266_v50 = vsel %vm264_vm4, %v265_v47, %v263_v48 }
  0x66   : > { %v268_v52 = vadd.f32 1e-05, %v266_v50  ;;  %495 = vrcp.f32 %v267_v51 }
  0x68   : > { %497 = vrcp.f32 %v268_v52 }
  0x73   : > { %v496_v56 = vpop.eup %495 }
  0x75   : > { %v498_v59 = vpop.eup %497 }
  0x76   : > { %v275_v61 = vcombine.low %v496_v56, %v498_v59 }
  0x78   : > { %v277_v63 = vmul.f32 %v275_v61, %v232_v22 }
  0xa7   : > { %v282_v62 = vpop.permute.xlu0 %281 }
  0xa8   : > { %v289_v0 = vrot.slane %v282_v62, %v288_v60 }
  0xaa   : > { %v291_v2 = vmul.f32 %v289_v0, %v277_v63 }
  0xab   : > { %v296_v1 = vpop.permute.xlu0 %295 }
  0xac   : > { %v303_v3 = vrot.slane %v296_v1, %v288_v60 }
  0xae   : > { %v305_v4 = vadd.f32 %v303_v3, %v291_v2 }
  0xb0   : > { %306 = vst [vmem:[%s204_s7] sm:$0xff] %v305_v4 }
  0xb1   : > { %540 = shalt.err (!%p537_p3)
}
  0xb2   : > { %s541_s28 = scalar_lea.hbm %s322_s11, 128  ;;  %s545_s30 = scalar_lea.hbm %s784_s3, 256 }
  0xb3   : > { %p542_p5 = scmp.ne.s32.totalorder %s322_s11, %s541_s28  ;;  %p546_p10 = scmp.lt.s32.totalorder %s322_s11, %s784_s3 }
  0xb4   : > { %p547_p4 = scmp.lt.s32.totalorder %s545_s30, %s541_s28 }
  0xb5   : > { %p543_p6 = pnand %p542_p5, %p684_p9 }
  0xb6   : > { %p548_p13 = por %p547_p4, %p546_p10 }
  0xb7   : > { %p544_p7 = pneg %p543_p6 }
  0xb9   : > { %p549_p8 = pnand %p548_p13, %p544_p7 }
  0xbb   : > { %552 = shalt.err (!%p549_p8)
}
  0xbc   : > { %427 = dma.vmem_to_hbm [thread:$0]  (%p684_p9), %s325_s8, 128, %s322_s11, %s308_s18  }
  0xbd PF: > { %s336_s6 = sand.u32 1, %s587_s12   ;;  %p790_p11 = scmp.ne.s32.totalorder %s788_s27, 0 }
  0xbe   : > { %p791_p12 = scmp.ge.s32.totalorder %s607_s17, 2  ;;  %s337_s24 = scalar_lea.sflag [#allocation4], %s336_s6 }
  0xc0   : > { %p434_p0 = pnand %p791_p12, %p790_p11 }
  0xc2   : > { %p435_p1 = pneg %p434_p0 }
  0xc4   : > { %582 = dma.done.wait (%p435_p1), %s337_s24, 128  }
  0xc5   : > { %584 = vsyncadd (%p435_p1), %s337_s24, 4294967168  ;;  %s19_s17 = sadd.s32 1, %s607_s17   ;;  %s792_s12 = smov %s591_s13 }
  0xc6   : > { %p16_p2 = scmp.ge.s32.totalorder %s19_s17, 4   ;;  %s793_s13 = smov %s595_s14 }
  0xc7   : > { %s794_s14 = smov %s689_s26  ;;  %s795_s15 = smov %s603_s16 }
  0xc8   : > { %s796_s16 = smov %s798_s20  ;;  %18 = sbr.rel (!%p16_p2) target bundleno = 6 (0x6), region = 77 }
  0xcd   :  { %342 = vsyncpa [#allocation3], 1 }
  0xce   :  { %344 = vsyncpa [#allocation3 + $0x1], 1 }
  0xcf   :  { %345 = vsyncpa [#allocation4], 1 }
  0xd0   :  { %347 = vsyncpa [#allocation4 + $0x1], 1 }

</bundles_post_ra>
